<compile_context>
chip_gen: v6e
topology: v6e:2x2x1
jax: 0.10.0
libtpu: 0.0.40
codegen_flags: <defaults>
</compile_context>

<pallas_src>
import functools

import jax
import jax.numpy as jnp
from jax import lax
from jax.experimental import pallas as pl
from jax.experimental.pallas import tpu as pltpu

_TK_MAX = 2048  # max hidden-dim tile (multiple of 128); full H used when H <= this


def _round_up(x: int, m: int) -> int:
    return ((x + m - 1) // m) * m


def _chip_defaults():
    """Per-generation row/vocab tile sizes and VMEM cap."""
    try:
        kind = jax.devices()[0].device_kind.lower()
    except Exception:  # pragma: no cover - defensive
        kind = ""
    if "v7" in kind:
        # 64 MiB physical VMEM per TC: moderate tiles, cap well below physical.
        return {"tm": 512, "tn": 1024, "vmem_cap": 56 * 1024 * 1024}
    if "v6" in kind:
        # v6e needs ~650 flop/byte to feed 918 TF/s over ~1.4 TB/s: go big.
        return {"tm": 1024, "tn": 1024, "vmem_cap": 100 * 1024 * 1024}
    if "v5" in kind and ("lite" in kind or "5e" in kind):
        # v5e only needs ~240 flop/byte; 512x1024 bf16 already MXU-bound.
        return {"tm": 512, "tn": 1024, "vmem_cap": 100 * 1024 * 1024}
    # Unknown / older chips: conservative middle ground.
    return {"tm": 512, "tn": 1024, "vmem_cap": 48 * 1024 * 1024}


# ----------------------------------------------------------------------------
# Kernels
# ----------------------------------------------------------------------------
def _fused_linear_kernel_1k(x_ref, w_ref, b_ref, o_ref):
    """Single-K-step kernel: no scratch, bias add + cast fused into the store."""
    acc = lax.dot_general(
        x_ref[...],
        w_ref[...],
        dimension_numbers=(((1,), (1,)), ((), ())),   # x @ w.T, no transpose op
        preferred_element_type=jnp.float32,
    )
    o_ref[...] = (acc + b_ref[...]).astype(o_ref.dtype)


def _fused_linear_kernel_mk(x_ref, w_ref, b_ref, o_ref, acc_ref):
    """Multi-K-step kernel: f32 VMEM accumulator, finalize on last K step."""
    k = pl.program_id(2)

    @pl.when(k == 0)
    def _init():
        acc_ref[...] = jnp.zeros_like(acc_ref)

    acc_ref[...] += lax.dot_general(
        x_ref[...],
        w_ref[...],
        dimension_numbers=(((1,), (1,)), ((), ())),
        preferred_element_type=jnp.float32,
    )

    @pl.when(k == pl.num_programs(2) - 1)
    def _finalize():
        o_ref[...] = (acc_ref[...] + b_ref[...]).astype(o_ref.dtype)


# ----------------------------------------------------------------------------
# Wrapper
# ----------------------------------------------------------------------------
def prepare_fused_params(w_first, b_first, w_second, b_second,
                         *, compute_dtype=jnp.bfloat16, tk_max=_TK_MAX):
    """One-time parameter prep (hoisted out of the per-call hot path).

    Concatenates the two vocab slices, casts weights to the compute dtype, and
    (only if H > tk_max and ragged) zero-pads the hidden dim once so the
    in-kernel reduction axis is always exact.
    """
    w = jnp.concatenate([w_first, w_second], axis=0).astype(compute_dtype)  # (V, H)
    b = jnp.concatenate([b_first, b_second], axis=0).astype(jnp.float32)[None, :]  # (1, V)
    h = w.shape[1]
    if h > tk_max and h % tk_max != 0:
        hp = _round_up(h, tk_max)
        w = jnp.pad(w, ((0, 0), (0, hp - h)))  # one-time; zeros are inert in the dot
    return w, b


def _fused_linear(x2d, w, b2d, out_dtype):
    """x2d: (M, H), w: (V, Hp), b2d: (1, V) f32  ->  (M, V) == x2d @ w[:, :H].T + b."""
    M, H = x2d.shape
    V, Hp = w.shape
    if H != Hp:  # weights were K-padded at prepare time; pad x cheaply per call
        x2d = jnp.pad(x2d, ((0, 0), (0, Hp - H)))

    cfg = _chip_defaults()
    itemsize = jnp.dtype(w.dtype).itemsize
    out_bytes = jnp.dtype(out_dtype).itemsize
    sub = max(8, 32 // max(itemsize, 1))            # sublane packing: 8 f32 / 16 bf16

    tm = min(cfg["tm"], _round_up(M, sub))          # row tile
    tn = min(cfg["tn"], _round_up(V, 128))          # vocab tile (lane-dense stores)
    tk = Hp if Hp <= _TK_MAX else _TK_MAX           # full hidden dim when it fits

    nb = pl.cdiv(V, tn)        # ragged last vocab tile: masked stores, no padding
    mb = pl.cdiv(M, tm)        # ragged last row tile: masked stores, no padding
    kb = Hp // tk              # exact by construction

    # VMEM budget from actual tile bytes (inputs/outputs double-buffered).
    vmem_need = (2 * (tm * tk + tn * tk) * itemsize   # x + w tiles
                 + 2 * tn * 4                         # bias tile (f32)
                 + 2 * tm * tn * out_bytes)           # output tile
    if kb > 1:
        vmem_need += tm * tn * 4                      # f32 accumulator scratch
    vmem_limit = min(cfg["vmem_cap"],
                     max(int(1.5 * vmem_need) + (4 << 20), 32 << 20))

    cost = pl.CostEstimate(
        flops=2 * M * V * Hp,
        transcendentals=0,
        bytes_accessed=(M * Hp * itemsize + V * Hp * itemsize
                        + V * 4 + M * V * out_bytes),
    )

    if kb == 1:
        # Common case: vocab axis outermost -> W block index constant across the
        # row axis, so each W tile is DMA'd exactly once (elided on revisit); when
        # mb == 1 as well, x is fetched once and stays VMEM-resident.
        grid = (nb, mb)
        in_specs = [
            pl.BlockSpec((tm, tk), lambda n, m: (m, 0)),   # x row tile
            pl.BlockSpec((tn, tk), lambda n, m: (n, 0)),   # weight tile
            pl.BlockSpec((1, tn), lambda n, m: (0, n)),    # bias tile
        ]
        out_specs = pl.BlockSpec((tm, tn), lambda n, m: (m, n))
        scratch = []
        kernel = _fused_linear_kernel_1k
        dim_sem = ("parallel", "parallel")
    else:
        grid = (nb, mb, kb)  # reduction axis last, "arbitrary"
        in_specs = [
            pl.BlockSpec((tm, tk), lambda n, m, k: (m, k)),
            pl.BlockSpec((tn, tk), lambda n, m, k: (n, k)),
            pl.BlockSpec((1, tn), lambda n, m, k: (0, n)),
        ]
        out_specs = pl.BlockSpec((tm, tn), lambda n, m, k: (m, n))
        scratch = [pltpu.VMEM((tm, tn), jnp.float32)]
        kernel = _fused_linear_kernel_mk
        dim_sem = ("parallel", "parallel", "arbitrary")

    return pl.pallas_call(
        kernel,
        out_shape=jax.ShapeDtypeStruct((M, V), out_dtype),
        grid_spec=pltpu.PrefetchScalarGridSpec(
            num_scalar_prefetch=0,
            grid=grid,
            in_specs=in_specs,
            out_specs=out_specs,
            scratch_shapes=scratch,
        ),
        compiler_params=pltpu.CompilerParams(
            dimension_semantics=dim_sem,
            vmem_limit_bytes=vmem_limit,
        ),
        cost_estimate=cost,
    )(x2d, w, b2d)


@functools.partial(jax.jit, static_argnames=("out_dtype",))
def sliced_output_embedding(x, w_fused, b_fused, *, out_dtype=None):
    """Forward of SlicedOutputEmbedding with pre-fused parameters.

    x:        (batch, seq, hidden)
    w_fused:  (vocab, hidden[_padded])  -- from prepare_fused_params
    b_fused:  (1, vocab) float32        -- from prepare_fused_params
    returns:  (batch, seq, vocab)
    """
    B, S, H = x.shape
    V = w_fused.shape[0]
    if out_dtype is None:
        out_dtype = x.dtype
    x2d = x.reshape(B * S, H).astype(w_fused.dtype)   # cast x to compute dtype
    out2d = _fused_linear(x2d, w_fused, b_fused, out_dtype)
    return out2d.reshape(B, S, V)


if __name__ == "__main__":
    # Small, module-consistent shapes: BERT-style output embedding
    # nn.Linear(hidden=32 -> vocab=16), sliced at slice_upperbound=6.
    batch, seq, hidden, vocab, slice_ub = 2, 8, 32, 16, 6

    key = jax.random.PRNGKey(0)
    kx, kw, kb = jax.random.split(key, 3)

    x = jax.random.normal(kx, (batch, seq, hidden), dtype=jnp.float32)
    w_full = jax.random.normal(kw, (vocab, hidden), dtype=jnp.float32) * 0.02
    b_full = jax.random.normal(kb, (vocab,), dtype=jnp.float32) * 0.02

    # __init__ slicing: first/second weight & bias slices.
    w_first, w_second = w_full[:slice_ub], w_full[slice_ub:]
    b_first, b_second = b_full[:slice_ub], b_full[slice_ub:]

    # Pure-JAX reference (same semantics as the PyTorch forward).
    ref = jnp.concatenate(
        [x @ w_first.T + b_first, x @ w_second.T + b_second], axis=-1
    )

    # --- Default (performance) path: bf16 operands, f32 accumulate. ----------
    w_bf16, b_f32 = prepare_fused_params(
        w_first, b_first, w_second, b_second, compute_dtype=jnp.bfloat16)
    out = jax.block_until_ready(sliced_output_embedding(x, w_bf16, b_f32))
    assert out.shape == (batch, seq, vocab), out.shape
    assert jnp.allclose(out, ref, atol=2e-2, rtol=2e-2), float(
        jnp.max(jnp.abs(out - ref)))

    # --- Exact (f32) path: bit-consistent with the reference. ----------------
    w_f32, b_f32b = prepare_fused_params(
        w_first, b_first, w_second, b_second, compute_dtype=jnp.float32)
    out_f32 = jax.block_until_ready(sliced_output_embedding(x, w_f32, b_f32b))
    assert jnp.allclose(out_f32, ref, atol=1e-5, rtol=1e-5), float(
        jnp.max(jnp.abs(out_f32 - ref)))

    print("KERNEL_OK")
</pallas_src>

<mosaic_0001>
module attributes {stable_mosaic.version = 11 : i64} {
  func.func @_fused_linear_kernel_1k(%arg0: i32, %arg1: i32, %arg2: memref<16x32xbf16, #tpu.memory_space<vmem>>, %arg3: memref<128x32xbf16, #tpu.memory_space<vmem>>, %arg4: memref<1x128xf32, #tpu.memory_space<vmem>>, %arg5: memref<16x128xf32, #tpu.memory_space<vmem>>) attributes {dimension_semantics = [#tpu.dimension_semantics<parallel>, #tpu.dimension_semantics<parallel>], iteration_bounds = array<i64: 1, 1>, scalar_prefetch = 0 : i64, scratch_operands = 0 : i64, tpu.core_type = #tpu.core_type<tc>, window_params = [{transform_indices = @transform_0, window_bounds = array<i64: 16, 32>}, {transform_indices = @transform_1, window_bounds = array<i64: 128, 32>}, {transform_indices = @transform_2, window_bounds = array<i64: 1, 128>}, {transform_indices = @transform_3, window_bounds = array<i64: 16, 128>}]} {
    %c0 = arith.constant 0 : index
    %c0_0 = arith.constant 0 : index
    %0 = vector.load %arg2[%c0, %c0_0] : memref<16x32xbf16, #tpu.memory_space<vmem>>, vector<16x32xbf16>
    %c0_1 = arith.constant 0 : index
    %c0_2 = arith.constant 0 : index
    %1 = vector.load %arg3[%c0_1, %c0_2] : memref<128x32xbf16, #tpu.memory_space<vmem>>, vector<128x32xbf16>
    %cst = arith.constant dense<0.000000e+00> : vector<16x128xf32>
    %2 = tpu.matmul %0, %1, %cst {dimension_numbers = #tpu.dot_dimension_numbers<[1], [1], [0], [0], [0, 0, 1, 0], [], []>} : vector<16x32xbf16>, vector<128x32xbf16>, vector<16x128xf32> -> vector<16x128xf32>
    %c0_3 = arith.constant 0 : index
    %c0_4 = arith.constant 0 : index
    %3 = vector.load %arg4[%c0_3, %c0_4] : memref<1x128xf32, #tpu.memory_space<vmem>>, vector<1x128xf32>
    %4 = vector.broadcast %3 : vector<1x128xf32> to vector<16x128xf32>
    %5 = arith.addf %2, %4 : vector<16x128xf32>
    %c0_5 = arith.constant 0 : index
    %c0_6 = arith.constant 0 : index
    %6 = vector.load %arg5[%c0_5, %c0_6] : memref<16x128xf32, #tpu.memory_space<vmem>>, vector<16x128xf32>
    tpu.vector_store %arg5[%c0_5, %c0_6], %5 {strides = array<i32>} : memref<16x128xf32, #tpu.memory_space<vmem>>, vector<16x128xf32>,
    return
  }
  func.func @transform_0(%arg0: i32, %arg1: i32) -> (i32, i32) {
    %c0_i32 = arith.constant 0 : i32
    %c0_i32_0 = arith.constant 0 : i32
    return %arg1, %c0_i32 : i32, i32
  }
  func.func @transform_1(%arg0: i32, %arg1: i32) -> (i32, i32) {
    %c0_i32 = arith.constant 0 : i32
    %c0_i32_0 = arith.constant 0 : i32
    return %arg0, %c0_i32 : i32, i32
  }
  func.func @transform_2(%arg0: i32, %arg1: i32) -> (i32, i32) {
    %c0_i32 = arith.constant 0 : i32
    %c0_i32_0 = arith.constant 0 : i32
    return %c0_i32, %arg0 : i32, i32
  }
  func.func @transform_3(%arg0: i32, %arg1: i32) -> (i32, i32) {
    %c0_i32 = arith.constant 0 : i32
    return %arg1, %arg0 : i32, i32
  }
}

</mosaic_0001>

<bundles_post_ra>
// kernel: sliced_output_embedding.1
= control target key start
LH: loop header
LB: loop body
LE: loop exit
PB: predicated region body
PF: predicated region fallthrough
CT: control target
= control target key end

     0   :  { %v249_v1 = vmov 0.0   ;;  %vm86_vm0 = vcmask 261120   ;;  %vm250_vm1 = vmmov 0   ;;  %s316_s0 = inlined_call_operand.vmem [shape: bf16[16,32], index: 0, kind: input, shape index: {}]   ;;  %s317_s1 = inlined_call_operand.vmem [shape: bf16[16,32], index: 1, kind: input, shape index: {}]   ;;  %s318_s2 = inlined_call_operand.vmem [shape: f32[1,16], index: 2, kind: input, shape index: {}]   ;;  %s319_s3 = inlined_call_operand.hbm [shape: f32[16,16], index: 3, kind: output, shape index: {}]  }
   0x1   :  { %v218_v0 = vld [vmem:[%s317_s1 + $0x38] sm:$0xff]   ;;  %193 = vmatprep.subr.bf16.mxu0 %v249_v1  ;;  %v219_v3 = vld [vmem:[%s317_s1 + $0x30] sm:$0xff]   ;;  %209 = vmatprep.mubr.msk.bf16.mxu0 %vm250_vm1, %v249_v1 }
   0x2   :  { %v112_v2 = vsel %vm86_vm0, %v218_v0, 0  ;;  %v109_v4 = vsel %vm86_vm0, %v219_v3, 0 }
   0x3   :  { %194 = vmatpush3.bf16.xpose.msra.mxu0 %v112_v2 }
   0x4   :  { %195 = vmatprep.subr.bf16.mxu0 %v249_v1 }
   0x5   :  { %8 = vsyncpa [#allocation3], 0  ;;  %v220_v5 = vld [vmem:[%s317_s1 + $0x28] sm:$0xff]   ;;  %v221_v7 = vld [vmem:[%s317_s1 + $0x20] sm:$0xff]   ;;  %s251_s5 = smov [#allocation2]  }
   0x6   :  { %v106_v6 = vsel %vm86_vm0, %v220_v5, 0  ;;  %v103_v8 = vsel %vm86_vm0, %v221_v7, 0  ;;  %v222_v9 = vld [vmem:[%s317_s1 + $0x18] sm:$0xff]   ;;  %v223_v11 = vld [vmem:[%s317_s1 + $0x10] sm:$0xff]   ;;  %v224_v13 = vld [vmem:[%s317_s1 + $0x8] sm:$0xff]   ;;  %s162_s6 = sshll.u32 %s251_s5, 4  ;;  %s163_s6 = int_to_ptr.vmem [resolvable:$true] %s162_s6 }
   0x7   :  { %v100_v10 = vsel %vm86_vm0, %v222_v9, 0  ;;  %v97_v12 = vsel %vm86_vm0, %v223_v11, 0  ;;  %v94_v14 = vsel %vm86_vm0, %v224_v13, 0  ;;  %v225_v15 = vld [vmem:[%s317_s1] sm:$0xff]   ;;  %s227_s1 = scalar_lea.vmem %s163_s6, 256  ;;  %p232_p1 = scmp.lt.s32.totalorder %s163_s6, %s163_s6 }
   0x8   :  { %v91_v16 = vsel %vm86_vm0, %v225_v15, 0  ;;  %v226_v17 = vld [vmem:[%s316_s0] sm:$0xff]   ;;  %p228_p0 = scmp.ne.s32.totalorder %s163_s6, %s227_s1  ;;  %p233_p2 = scmp.lt.s32.totalorder %s227_s1, %s227_s1 }
   0x9   :  { %v173_v18 = vld [vmem:[%s318_s2] ss:$0 sm:$0xff] }
   0xa   :  { %p234_p3 = por %p233_p2, %p232_p1 }
   0xb   :  { %196 = vmatpush3.bf16.xpose.msra.mxu0 %v109_v4 }
   0xc   :  { %197 = vmatprep.subr.bf16.mxu0 %v249_v1  ;;  %p235_p4 = pnand %p234_p3, %p228_p0 }
  0x13   :  { %198 = vmatpush3.bf16.xpose.msra.mxu0 %v106_v6 }
  0x14   :  { %199 = vmatprep.subr.bf16.mxu0 %v249_v1 }
  0x1b   :  { %200 = vmatpush3.bf16.xpose.msra.mxu0 %v103_v8 }
  0x1c   :  { %201 = vmatprep.subr.bf16.mxu0 %v249_v1 }
  0x23   :  { %202 = vmatpush3.bf16.xpose.msra.mxu0 %v100_v10 }
  0x24   :  { %203 = vmatprep.subr.bf16.mxu0 %v249_v1 }
  0x2b   :  { %204 = vmatpush3.bf16.xpose.msra.mxu0 %v97_v12 }
  0x2c   :  { %205 = vmatprep.subr.bf16.mxu0 %v249_v1 }
  0x33   :  { %206 = vmatpush3.bf16.xpose.msra.mxu0 %v94_v14 }
  0x34   :  { %207 = vmatprep.subr.bf16.mxu0 %v249_v1 }
  0x3b   :  { %208 = vmatpush3.bf16.xpose.msra.mxu0 %v91_v16 }
  0x42   :  { %210 = vmatmul.mubr.msk.bf16.vlgmr.msra.gmra.mxu0 %vm86_vm0, %v226_v17 }
 0x102   :  { %v148_v19 = vpop.f32.mrf.mxu0 }
 0x103   :  { %v149_v20 = vadd.f32 %v173_v18, %v148_v19 }
 0x104   :  { %v211_v21 = vpop.f32.mrf.mxu0 }
 0x105   :  { %155 = vst [vmem:[#allocation2] sm:$0xff] %v149_v20 }
 0x106   :  { %v151_v22 = vpop.f32.mrf.mxu0 }
 0x107   :  { %v152_v23 = vadd.f32 %v173_v18, %v151_v22 }
 0x108   :  { %v212_v24 = vpop.f32.mrf.mxu0 }
 0x109   :  { %156 = vst [vmem:[#allocation2 + $0x8] sm:$0xff] %v152_v23 }
 0x10a   :  { %238 = shalt.err (!%p235_p4)
}
 0x10b   :  { %s252_s0 = smov 128   ;;  %s253_s2 = smov 8  }
 0x10c   :  { %168 = dma.vmem_to_hbm [thread:$0]  %s163_s6, 256, %s319_s3, [#allocation3], %s252_s0, %s252_s0, %s253_s2  }
 0x10d   :  { %247 = dma.done.wait [#allocation3], 256  }
 0x10e   :  { %248 = vsyncadd [#allocation3], 4294967040 }
 0x10f   :  { %172 = vsyncpa [#allocation3], 1 }

</bundles_post_ra>
